<compile_context>
chip_gen: v7x
topology: tpu7x:2x2x1
jax: 0.10.0
libtpu: 0.0.40
codegen_flags: <defaults>
</compile_context>

<pallas_src>
import jax
import jax.numpy as jnp
from jax.experimental import pallas as pl
from jax.experimental.pallas import tpu as pltpu

ALPHA = 0.1
BETA = 0.001

LANE = 128
# Max lane-tile per grid step: 3 * TN_MAX * 4 B = 1.5 MiB per block.
# Input + output, double-buffered -> ~6 MiB VMEM: safe on every generation.
TN_MAX = 128 * 1024


def _round_up(x, m):
    return ((x + m - 1) // m) * m


def _sir_kernel(y_ref, dy_ref):
    # y_ref / dy_ref: (3, TN) VMEM blocks; row 0 = S, row 1 = I, row 2 = R.
    yb = y_ref[...]                       # single full-block load
    s = yb[0:1, :]                        # (1, TN)
    i = yb[1:2, :]                        # (1, TN)
    # row 2 (R) is unused by the dynamics, matching the PyTorch reference.

    p = BETA * (s * i)                    # beta * s * i   (computed once)
    a = ALPHA * i                         # alpha * i      (computed once)

    # Single full-block store: [-p ; p - a ; a] stacked along the state axis.
    dy_ref[...] = jnp.concatenate([-p, p - a, a], axis=0)


def sir_forward(t, y):
    """Pallas equivalent of SIR.forward(t, y).

    `t` is unused (as in the reference module). y: (3,) or (3, N) -> same shape.
    """
    del t  # unused by the dynamics
    squeeze = y.ndim == 1
    if squeeze:
        y = y[:, None]
    assert y.ndim == 2 and y.shape[0] == 3, "expected y of shape (3,) or (3, N)"
    n = y.shape[1]
    dtype = y.dtype

    # Tiny states (e.g. the classic scalar SIR state, N == 1): pad the lane
    # axis up to one vreg width. Moves < 1.5 KiB; large N never takes this path.
    n_run = n
    if n < LANE:
        y = jnp.pad(y, ((0, 0), (0, LANE - n)))
        n_run = LANE

    # Lane tile: multiple of 128, >= 2 grid steps whenever possible (so the
    # 'parallel' axis shards across both TensorCores on v7x), capped at 1.5 MiB
    # blocks for full-roofline streaming with a small VMEM footprint.
    if n_run <= LANE:
        tn = LANE
    else:
        tn = min(TN_MAX, _round_up(pl.cdiv(n_run, 2), LANE))
    grid_n = pl.cdiv(n_run, tn)

    itemsize = jnp.dtype(dtype).itemsize
    cost = pl.CostEstimate(
        flops=5 * n_run,                        # ~5 flops per sample
        transcendentals=0,
        bytes_accessed=6 * n_run * itemsize,    # read 3 planes + write 3 planes
    )

    dy = pl.pallas_call(
        _sir_kernel,
        out_shape=jax.ShapeDtypeStruct((3, n_run), dtype),
        grid=(grid_n,),
        in_specs=[pl.BlockSpec((3, tn), lambda j: (0, j))],
        out_specs=pl.BlockSpec((3, tn), lambda j: (0, j)),
        compiler_params=pltpu.CompilerParams(
            dimension_semantics=("parallel",),
        ),
        cost_estimate=cost,
    )(y)

    if n_run != n:
        dy = dy[:, :n]
    if squeeze:
        dy = dy[:, 0]
    return dy


def _sir_ref(t, y):
    s, i = y[0], y[1]
    ds = -BETA * s * i
    di = BETA * s * i - ALPHA * i
    dr = ALPHA * i
    return jnp.stack([ds, di, dr])


if __name__ == "__main__":
    t = jnp.float32(0.0)

    # Lane-aligned case (single block).
    y1 = jax.random.uniform(jax.random.PRNGKey(0), (3, 128), dtype=jnp.float32,
                            minval=0.0, maxval=100.0)
    dy1 = jax.block_until_ready(sir_forward(t, y1))
    assert dy1.shape == y1.shape and dy1.dtype == y1.dtype
    assert jnp.allclose(dy1, _sir_ref(t, y1), rtol=1e-6, atol=1e-6)

    # Non-multiple-of-128 case: grid of 2 with a masked partial last block,
    # no wrapper-side pad/slice.
    y2 = jax.random.uniform(jax.random.PRNGKey(1), (3, 200), dtype=jnp.float32,
                            minval=0.0, maxval=100.0)
    dy2 = jax.block_until_ready(sir_forward(t, y2))
    assert dy2.shape == y2.shape
    assert jnp.allclose(dy2, _sir_ref(t, y2), rtol=1e-6, atol=1e-6)

    # Classic scalar SIR state, shape (3,), as used by ODE integrators.
    y3 = jnp.array([999.0, 1.0, 0.0], dtype=jnp.float32)
    dy3 = jax.block_until_ready(sir_forward(t, y3))
    assert dy3.shape == (3,)
    assert jnp.allclose(dy3, _sir_ref(t, y3[:, None])[:, 0], rtol=1e-6, atol=1e-6)

    print("KERNEL_OK")
</pallas_src>

<mosaic_0001>
module attributes {stable_mosaic.version = 11 : i64} {
  func.func @_sir_kernel(%arg0: i32, %arg1: memref<3x128xf32, #tpu.memory_space<vmem>>, %arg2: memref<3x128xf32, #tpu.memory_space<vmem>>) attributes {dimension_semantics = [#tpu.dimension_semantics<parallel>], iteration_bounds = array<i64: 1>, scalar_prefetch = 0 : i64, scratch_operands = 0 : i64, tpu.core_type = #tpu.core_type<tc>, window_params = [{transform_indices = @transform_0, window_bounds = array<i64: 3, 128>}, {transform_indices = @transform_1, window_bounds = array<i64: 3, 128>}]} {
    %c0 = arith.constant 0 : index
    %c0_0 = arith.constant 0 : index
    %0 = vector.load %arg1[%c0, %c0_0] : memref<3x128xf32, #tpu.memory_space<vmem>>, vector<3x128xf32>
    %1 = vector.extract_strided_slice %0 {offsets = [0, 0], sizes = [1, 128], strides = [1, 1]} : vector<3x128xf32> to vector<1x128xf32>
    %2 = vector.extract_strided_slice %0 {offsets = [1, 0], sizes = [1, 128], strides = [1, 1]} : vector<3x128xf32> to vector<1x128xf32>
    %3 = arith.mulf %1, %2 : vector<1x128xf32>
    %cst = arith.constant 1.000000e-03 : f32
    %4 = vector.broadcast %cst : f32 to vector<1x128xf32>
    %5 = arith.mulf %4, %3 : vector<1x128xf32>
    %cst_1 = arith.constant 1.000000e-01 : f32
    %6 = vector.broadcast %cst_1 : f32 to vector<1x128xf32>
    %7 = arith.mulf %6, %2 : vector<1x128xf32>
    %cst_2 = arith.constant 0.000000e+00 : f32
    %8 = vector.broadcast %cst_2 : f32 to vector<1x128xf32>
    %9 = arith.subf %8, %5 : vector<1x128xf32>
    %10 = arith.subf %5, %7 : vector<1x128xf32>
    %11 = tpu.concatenate %9, %10, %7 in 0 : vector<1x128xf32>, vector<1x128xf32>, vector<1x128xf32> -> vector<3x128xf32>
    %c0_3 = arith.constant 0 : index
    %c0_4 = arith.constant 0 : index
    %12 = vector.load %arg2[%c0_3, %c0_4] : memref<3x128xf32, #tpu.memory_space<vmem>>, vector<3x128xf32>
    tpu.vector_store %arg2[%c0_3, %c0_4], %11 {strides = array<i32>} : memref<3x128xf32, #tpu.memory_space<vmem>>, vector<3x128xf32>,
    return
  }
  func.func @transform_0(%arg0: i32) -> (i32, i32) {
    %c0_i32 = arith.constant 0 : i32
    %c0_i32_0 = arith.constant 0 : i32
    return %c0_i32, %arg0 : i32, i32
  }
  func.func @transform_1(%arg0: i32) -> (i32, i32) {
    %c0_i32 = arith.constant 0 : i32
    %c0_i32_0 = arith.constant 0 : i32
    return %c0_i32, %arg0 : i32, i32
  }
}

</mosaic_0001>

<bundles_post_ra>
// kernel: tpu_custom_call.1
= control target key start
LH: loop header
LB: loop body
LE: loop exit
PB: predicated region body
PF: predicated region fallthrough
CT: control target
= control target key end

     0   :  { %6 = vsyncpa [#allocation3], 0  ;;  %s144_s0 = inlined_call_operand.hbm [shape: f32[3,128], index: 0, kind: input, shape index: {}]   ;;  %s145_s1 = inlined_call_operand.hbm [shape: f32[3,128], index: 1, kind: output, shape index: {}]  }
   0x1   :  { %7 = vsyncpa [#allocation4], 0  ;;  %s108_s6 = smov [#allocation2]   ;;  %s60_s10 = scalar_lea.hbm %s144_s0, 64 }
   0x2   :  { %s14_s7 = sshll.u32 %s108_s6, 4  ;;  %p61_p0 = scmp.ne.s32.totalorder %s144_s0, %s60_s10  ;;  %s15_s7 = int_to_ptr.vmem [resolvable:$true] %s14_s7 }
   0x3   :  { %p64_p1 = scmp.lt.u32.totalorder %s60_s10, %s144_s0 }
   0x5   :  { %p66_p2 = pnand %p64_p1, %p61_p0 }
   0x7   :  { %69 = shalt.err (!%p66_p2)
}
   0x8   :  { %s70_s15 = scalar_lea.vmem %s15_s7, 64  ;;  %p75_p4 = scmp.lt.s32.totalorder %s15_s7, %s15_s7 }
   0x9   :  { %p71_p3 = scmp.ne.s32.totalorder %s15_s7, %s70_s15  ;;  %p76_p5 = scmp.lt.s32.totalorder %s70_s15, %s70_s15 }
   0xb   :  { %p77_p6 = por %p76_p5, %p75_p4 }
   0xd   :  { %p78_p7 = pnand %p77_p6, %p71_p3 }
   0xf   :  { %81 = shalt.err (!%p78_p7)
}
  0x10   :  { %17 = dma.hbm_to_vmem [thread:$0]  %s144_s0, 64, %s15_s7, [#allocation3]  }
  0x11   :  { %104 = dma.done.wait [#allocation3], 64  }
  0x12   :  { %105 = vsyncadd [#allocation3], 4294967232  ;;  %v21_v0 = vld [vmem:[#allocation2] sm:$0x7]  ;;  %vm38_vm0 = vcmask 1040384   ;;  %s109_s18 = smov [#allocation5]  }
  0x13   :  { %v23_v1 = vrot.slane %v21_v0, 1  ;;  %v27_v2 = vmul.f32 0.1, %v21_v0  ;;  %s49_s19 = sshll.u32 %s109_s18, 4  ;;  %vm40_vm1 = vcmask 1041408   ;;  %s50_s19 = int_to_ptr.vmem [resolvable:$true] %s49_s19 }
  0x14   :  { %s82_s0 = scalar_lea.vmem %s50_s19, 64  ;;  %p87_p9 = scmp.lt.s32.totalorder %s50_s19, %s50_s19 }
  0x15   :  { %v25_v3 = vmul.f32 %v23_v1, %v21_v0  ;;  %v30_v4 = vrot.slane %v27_v2, 1  ;;  %v36_v8 = vrot.slane %v27_v2, 7  ;;  %p83_p8 = scmp.ne.s32.totalorder %s50_s19, %s82_s0  ;;  %p88_p10 = scmp.lt.s32.totalorder %s82_s0, %s82_s0 }
  0x17   :  { %v26_v5 = vmul.f32 0.001, %v25_v3  ;;  %p89_p11 = por %p88_p10, %p87_p9 }
  0x19   :  { %v28_v6 = vsub.f32 0.0, %v26_v5  ;;  %v32_v7 = vsub.f32 %v26_v5, %v30_v4  ;;  %p90_p12 = pnand %p89_p11, %p83_p8 }
  0x1b   :  { %v34_v9 = vrot.slane %v32_v7, 7 }
  0x1d   :  { %v39_v10 = vsel %vm38_vm0, %v28_v6, %v34_v9 }
  0x1e   :  { %v41_v11 = vsel %vm40_vm1, %v39_v10, %v36_v8 }
  0x1f   :  { %42 = vst [vmem:[#allocation5] sm:$0x7] %v41_v11 }
  0x20   :  { %93 = shalt.err (!%p90_p12)
}
  0x21   :  { %s94_s22 = scalar_lea.hbm %s145_s1, 64 }
  0x22   :  { %p95_p13 = scmp.ne.s32.totalorder %s145_s1, %s94_s22  ;;  %p98_p0 = scmp.lt.u32.totalorder %s94_s22, %s145_s1 }
  0x24   :  { %p100_p1 = pnand %p98_p0, %p95_p13 }
  0x26   :  { %103 = shalt.err (!%p100_p1)
}
  0x27   :  { %52 = dma.vmem_to_hbm [thread:$0]  %s50_s19, 64, %s145_s1, [#allocation4]  }
  0x28   :  { %106 = dma.done.wait [#allocation4], 64  }
  0x29   :  { %107 = vsyncadd [#allocation4], 4294967232 }
  0x2a   :  { %56 = vsyncpa [#allocation3], 1 }
  0x2b   :  { %57 = vsyncpa [#allocation4], 1 }

</bundles_post_ra>
